<compile_context>
chip_gen: v6e
topology: v6e:2x2x1
jax: 0.10.0
libtpu: 0.0.40
codegen_flags: <defaults>
</compile_context>

<pallas_src>
import functools

import jax
import jax.numpy as jnp
from jax.experimental import pallas as pl
from jax.experimental.pallas import tpu as pltpu

LANE = 128
SUBLANE = 8


def _round_up(v, m):
    return (v + m - 1) // m * m


def _pad2d(a, rows, cols):
    r, c = a.shape
    return jnp.pad(a, ((0, rows - r), (0, cols - c)))


# ----------------------------------------------------------------------------
# Fused whole-network kernel
# ----------------------------------------------------------------------------
def _fused_mlpr_kernel(*refs, n_layers, residual_flags, tanh_flags, compute_dtype):
    """refs = (x_ref, w0_ref, b0_ref, ..., w{L}_ref, b{L}_ref, o_ref).

    Every weight ref is already transposed (K_pad, N_pad); every bias ref is (1, N_pad).
    The activation stays on-chip (values / VMEM) for the entire network.
    """
    x_ref = refs[0]
    o_ref = refs[1 + 2 * n_layers]

    h = x_ref[...].astype(jnp.float32)
    for idx in range(n_layers):
        w_ref = refs[1 + 2 * idx]
        b_ref = refs[2 + 2 * idx]
        # Single-K-step matmul on the MXU; f32 accumulate, f32 epilogue.
        y = jnp.dot(h.astype(compute_dtype),
                    w_ref[...].astype(compute_dtype),
                    preferred_element_type=jnp.float32)
        y = y + b_ref[...].astype(jnp.float32)
        if residual_flags[idx]:
            y = y + h                       # residual from the VMEM-resident activation
        if tanh_flags[idx]:
            y = jnp.tanh(y)
        h = y
    o_ref[...] = h.astype(o_ref.dtype)


# ----------------------------------------------------------------------------
# One-time parameter prep (hoisted out of the forward pass)
# ----------------------------------------------------------------------------
def prepare_mlpr_params(params):
    """params: list of (weight(out,in), bias(out,)) in PyTorch layout.

    Returns (padded_layers, num_inputs, num_outputs) where padded_layers is a list of
    (w_t_padded(K_pad, N_pad), bias_padded(1, N_pad)) — done once, reused every forward.
    """
    padded_layers = []
    for (w, b) in params:
        fout, fin = w.shape
        kp = _round_up(fin, LANE)
        np_ = _round_up(fout, LANE)
        w_t = _pad2d(jnp.transpose(w), kp, np_)          # (K_pad, N_pad)
        b2 = _pad2d(b.reshape(1, -1), 1, np_)            # (1, N_pad)
        padded_layers.append((w_t, b2))
    num_inputs = params[0][0].shape[1]
    num_outputs = params[-1][0].shape[0]
    return padded_layers, num_inputs, num_outputs


# ----------------------------------------------------------------------------
# Forward pass: single fused pallas_call
# ----------------------------------------------------------------------------
def mlpr_forward(x, prepared, *, compute_dtype=jnp.float32):
    """x: (B, num_inputs). prepared: output of prepare_mlpr_params."""
    padded_layers, num_inputs, num_outputs = prepared
    B, f_in = x.shape
    assert f_in == num_inputs
    n_layers = len(padded_layers)

    kin_pad = padded_layers[0][0].shape[0]
    nout_pad = padded_layers[-1][0].shape[1]

    # Batch padding / tiling. Grid only over M, marked "parallel".
    b_pad = _round_up(B, SUBLANE)
    if b_pad <= SUBLANE:
        tm = b_pad
    elif b_pad <= 1024:
        # Split into >= 2 parallel steps when possible (v7x has 2 TensorCores).
        tm = b_pad // 2 if (b_pad // 2) % SUBLANE == 0 else b_pad
    else:
        tm = 512
        b_pad = _round_up(B, tm)
    grid_m = b_pad // tm

    x_p = _pad2d(x, b_pad, kin_pad)

    # VMEM-resident weights/biases: index_map constant across the grid, fetched once.
    in_specs = [pl.BlockSpec((tm, kin_pad), lambda i: (i, 0))]          # x tile
    args = [x_p]
    for (w_t, b2) in padded_layers:
        kp, np_ = w_t.shape
        in_specs.append(pl.BlockSpec((kp, np_), lambda i: (0, 0)))      # full weight
        in_specs.append(pl.BlockSpec((1, np_), lambda i: (0, 0)))       # full bias
        args.append(w_t)
        args.append(b2)

    out_spec = pl.BlockSpec((tm, nout_pad), lambda i: (i, 0))

    # residual on hidden LinearWithResidual layers, tanh on all but the last Linear.
    residual_flags = tuple(0 < idx < n_layers - 1 for idx in range(n_layers))
    tanh_flags = tuple(idx < n_layers - 1 for idx in range(n_layers))

    kernel = functools.partial(
        _fused_mlpr_kernel,
        n_layers=n_layers,
        residual_flags=residual_flags,
        tanh_flags=tanh_flags,
        compute_dtype=compute_dtype,
    )

    # Cost estimate (padded dims) + VMEM budget: resident params + double-buffered
    # x/out tiles + a few activation-sized temporaries. Capped well under v7x's 64 MiB.
    itemsize = jnp.dtype(x.dtype).itemsize
    flops = 0
    transcendentals = 0
    param_bytes = 0
    for idx, (w_t, b2) in enumerate(padded_layers):
        kp, np_ = w_t.shape
        flops += 2 * b_pad * kp * np_
        if tanh_flags[idx]:
            transcendentals += b_pad * np_
        param_bytes += (w_t.size + b2.size) * 4
    bytes_accessed = (x_p.size + b_pad * nout_pad) * itemsize + param_bytes
    cost = pl.CostEstimate(flops=flops, transcendentals=transcendentals,
                           bytes_accessed=bytes_accessed)

    max_width = max(kin_pad, nout_pad,
                    max(w.shape[1] for (w, _) in padded_layers))
    tile_bytes = 2 * itemsize * (tm * kin_pad + tm * nout_pad)   # double-buffered x/out
    act_bytes = 4 * 4 * tm * max_width                            # f32 temporaries
    vmem_needed = param_bytes + tile_bytes + act_bytes
    vmem_limit = int(min(max(2 * vmem_needed, 8 * 1024 * 1024), 40 * 1024 * 1024))
    # TODO(synk): for very large hidden widths (padded weights > ~40 MiB) fall back to a
    # per-layer tiled kernel instead of whole-network fusion.
    assert param_bytes <= 40 * 1024 * 1024, "weights too large for fused VMEM kernel"

    out = pl.pallas_call(
        kernel,
        out_shape=jax.ShapeDtypeStruct((b_pad, nout_pad), x.dtype),
        grid_spec=pltpu.PrefetchScalarGridSpec(
            num_scalar_prefetch=0,
            grid=(grid_m,),
            in_specs=in_specs,
            out_specs=out_spec,
        ),
        compiler_params=pltpu.CompilerParams(
            dimension_semantics=("parallel",),
            vmem_limit_bytes=vmem_limit,
        ),
        cost_estimate=cost,
    )(*args)

    return out[:B, :num_outputs]


# ----------------------------------------------------------------------------
# Pure-JAX reference and parameter init (PyTorch nn.Linear default init)
# ----------------------------------------------------------------------------
def mlpr_reference(x, params):
    h = x
    n = len(params)
    for idx, (w, b) in enumerate(params):
        y = h @ w.T + b
        if 0 < idx < n - 1:          # LinearWithResidual layers
            y = y + h
        if idx < n - 1:              # tanh on all but the final Linear
            y = jnp.tanh(y)
        h = y
    return h


def init_mlpr_params(key, num_inputs, num_neurals=32, num_layers=4, num_outputs=1):
    dims = ([(num_inputs, num_neurals)]
            + [(num_neurals, num_neurals)] * (num_layers - 1)
            + [(num_neurals, num_outputs)])
    params = []
    for fin, fout in dims:
        key, kw, kb = jax.random.split(key, 3)
        bound = 1.0 / (fin ** 0.5)      # nn.Linear default init bound
        w = jax.random.uniform(kw, (fout, fin), minval=-bound, maxval=bound,
                               dtype=jnp.float32)
        b = jax.random.uniform(kb, (fout,), minval=-bound, maxval=bound,
                               dtype=jnp.float32)
        params.append((w, b))
    return params


if __name__ == "__main__":
    key = jax.random.PRNGKey(0)
    B, num_inputs, num_neurals, num_layers, num_outputs = 16, 2, 32, 4, 1

    key, kx = jax.random.split(key)
    x = jax.random.normal(kx, (B, num_inputs), dtype=jnp.float32)
    params = init_mlpr_params(key, num_inputs, num_neurals, num_layers, num_outputs)

    prepared = prepare_mlpr_params(params)     # one-time weight transpose + pad
    out = mlpr_forward(x, prepared)
    out = jax.block_until_ready(out)

    ref = mlpr_reference(x, params)
    assert out.shape == (B, num_outputs), f"bad output shape {out.shape}"
    assert jnp.allclose(out, ref, atol=1e-4, rtol=1e-4), "mismatch vs reference"

    print("KERNEL_OK")
</pallas_src>

<mosaic_0001>
module attributes {stable_mosaic.version = 11 : i64} {
  func.func @_fused_mlpr_kernel(%arg0: i32, %arg1: memref<8x128xf32, #tpu.memory_space<vmem>>, %arg2: memref<128x128xf32, #tpu.memory_space<vmem>>, %arg3: memref<1x128xf32, #tpu.memory_space<vmem>>, %arg4: memref<128x128xf32, #tpu.memory_space<vmem>>, %arg5: memref<1x128xf32, #tpu.memory_space<vmem>>, %arg6: memref<128x128xf32, #tpu.memory_space<vmem>>, %arg7: memref<1x128xf32, #tpu.memory_space<vmem>>, %arg8: memref<128x128xf32, #tpu.memory_space<vmem>>, %arg9: memref<1x128xf32, #tpu.memory_space<vmem>>, %arg10: memref<128x128xf32, #tpu.memory_space<vmem>>, %arg11: memref<1x128xf32, #tpu.memory_space<vmem>>, %arg12: memref<8x128xf32, #tpu.memory_space<vmem>>) attributes {dimension_semantics = [#tpu.dimension_semantics<parallel>], iteration_bounds = array<i64: 2>, scalar_prefetch = 0 : i64, scratch_operands = 0 : i64, tpu.core_type = #tpu.core_type<tc>, window_params = [{transform_indices = @transform_0, window_bounds = array<i64: 8, 128>}, {pipeline_mode = #tpu.pipeline_mode<synchronous>, transform_indices = @transform_1, window_bounds = array<i64: 128, 128>}, {pipeline_mode = #tpu.pipeline_mode<synchronous>, transform_indices = @transform_2, window_bounds = array<i64: 1, 128>}, {pipeline_mode = #tpu.pipeline_mode<synchronous>, transform_indices = @transform_3, window_bounds = array<i64: 128, 128>}, {pipeline_mode = #tpu.pipeline_mode<synchronous>, transform_indices = @transform_4, window_bounds = array<i64: 1, 128>}, {pipeline_mode = #tpu.pipeline_mode<synchronous>, transform_indices = @transform_5, window_bounds = array<i64: 128, 128>}, {pipeline_mode = #tpu.pipeline_mode<synchronous>, transform_indices = @transform_6, window_bounds = array<i64: 1, 128>}, {pipeline_mode = #tpu.pipeline_mode<synchronous>, transform_indices = @transform_7, window_bounds = array<i64: 128, 128>}, {pipeline_mode = #tpu.pipeline_mode<synchronous>, transform_indices = @transform_8, window_bounds = array<i64: 1, 128>}, {pipeline_mode = #tpu.pipeline_mode<synchronous>, transform_indices = @transform_9, window_bounds = array<i64: 128, 128>}, {pipeline_mode = #tpu.pipeline_mode<synchronous>, transform_indices = @transform_10, window_bounds = array<i64: 1, 128>}, {transform_indices = @transform_11, window_bounds = array<i64: 8, 128>}]} {
    %c0 = arith.constant 0 : index
    %c0_0 = arith.constant 0 : index
    %0 = vector.load %arg1[%c0, %c0_0] : memref<8x128xf32, #tpu.memory_space<vmem>>, vector<8x128xf32>
    %c0_1 = arith.constant 0 : index
    %c0_2 = arith.constant 0 : index
    %1 = vector.load %arg2[%c0_1, %c0_2] : memref<128x128xf32, #tpu.memory_space<vmem>>, vector<128x128xf32>
    %cst = arith.constant dense<0.000000e+00> : vector<8x128xf32>
    %2 = tpu.matmul %0, %1, %cst {dimension_numbers = #tpu.dot_dimension_numbers<[1], [0], [0], [1], [0, 0, 1, 1], [], []>} : vector<8x128xf32>, vector<128x128xf32>, vector<8x128xf32> -> vector<8x128xf32>
    %c0_3 = arith.constant 0 : index
    %c0_4 = arith.constant 0 : index
    %3 = vector.load %arg3[%c0_3, %c0_4] : memref<1x128xf32, #tpu.memory_space<vmem>>, vector<1x128xf32>
    %4 = vector.broadcast %3 : vector<1x128xf32> to vector<8x128xf32>
    %5 = arith.addf %2, %4 : vector<8x128xf32>
    %6 = math.tanh %5 : vector<8x128xf32>
    %c0_5 = arith.constant 0 : index
    %c0_6 = arith.constant 0 : index
    %7 = vector.load %arg4[%c0_5, %c0_6] : memref<128x128xf32, #tpu.memory_space<vmem>>, vector<128x128xf32>
    %cst_7 = arith.constant dense<0.000000e+00> : vector<8x128xf32>
    %8 = tpu.matmul %6, %7, %cst_7 {dimension_numbers = #tpu.dot_dimension_numbers<[1], [0], [0], [1], [0, 0, 1, 1], [], []>} : vector<8x128xf32>, vector<128x128xf32>, vector<8x128xf32> -> vector<8x128xf32>
    %c0_8 = arith.constant 0 : index
    %c0_9 = arith.constant 0 : index
    %9 = vector.load %arg5[%c0_8, %c0_9] : memref<1x128xf32, #tpu.memory_space<vmem>>, vector<1x128xf32>
    %10 = vector.broadcast %9 : vector<1x128xf32> to vector<8x128xf32>
    %11 = arith.addf %8, %10 : vector<8x128xf32>
    %12 = arith.addf %11, %6 : vector<8x128xf32>
    %13 = math.tanh %12 : vector<8x128xf32>
    %c0_10 = arith.constant 0 : index
    %c0_11 = arith.constant 0 : index
    %14 = vector.load %arg6[%c0_10, %c0_11] : memref<128x128xf32, #tpu.memory_space<vmem>>, vector<128x128xf32>
    %cst_12 = arith.constant dense<0.000000e+00> : vector<8x128xf32>
    %15 = tpu.matmul %13, %14, %cst_12 {dimension_numbers = #tpu.dot_dimension_numbers<[1], [0], [0], [1], [0, 0, 1, 1], [], []>} : vector<8x128xf32>, vector<128x128xf32>, vector<8x128xf32> -> vector<8x128xf32>
    %c0_13 = arith.constant 0 : index
    %c0_14 = arith.constant 0 : index
    %16 = vector.load %arg7[%c0_13, %c0_14] : memref<1x128xf32, #tpu.memory_space<vmem>>, vector<1x128xf32>
    %17 = vector.broadcast %16 : vector<1x128xf32> to vector<8x128xf32>
    %18 = arith.addf %15, %17 : vector<8x128xf32>
    %19 = arith.addf %18, %13 : vector<8x128xf32>
    %20 = math.tanh %19 : vector<8x128xf32>
    %c0_15 = arith.constant 0 : index
    %c0_16 = arith.constant 0 : index
    %21 = vector.load %arg8[%c0_15, %c0_16] : memref<128x128xf32, #tpu.memory_space<vmem>>, vector<128x128xf32>
    %cst_17 = arith.constant dense<0.000000e+00> : vector<8x128xf32>
    %22 = tpu.matmul %20, %21, %cst_17 {dimension_numbers = #tpu.dot_dimension_numbers<[1], [0], [0], [1], [0, 0, 1, 1], [], []>} : vector<8x128xf32>, vector<128x128xf32>, vector<8x128xf32> -> vector<8x128xf32>
    %c0_18 = arith.constant 0 : index
    %c0_19 = arith.constant 0 : index
    %23 = vector.load %arg9[%c0_18, %c0_19] : memref<1x128xf32, #tpu.memory_space<vmem>>, vector<1x128xf32>
    %24 = vector.broadcast %23 : vector<1x128xf32> to vector<8x128xf32>
    %25 = arith.addf %22, %24 : vector<8x128xf32>
    %26 = arith.addf %25, %20 : vector<8x128xf32>
    %27 = math.tanh %26 : vector<8x128xf32>
    %c0_20 = arith.constant 0 : index
    %c0_21 = arith.constant 0 : index
    %28 = vector.load %arg10[%c0_20, %c0_21] : memref<128x128xf32, #tpu.memory_space<vmem>>, vector<128x128xf32>
    %cst_22 = arith.constant dense<0.000000e+00> : vector<8x128xf32>
    %29 = tpu.matmul %27, %28, %cst_22 {dimension_numbers = #tpu.dot_dimension_numbers<[1], [0], [0], [1], [0, 0, 1, 1], [], []>} : vector<8x128xf32>, vector<128x128xf32>, vector<8x128xf32> -> vector<8x128xf32>
    %c0_23 = arith.constant 0 : index
    %c0_24 = arith.constant 0 : index
    %30 = vector.load %arg11[%c0_23, %c0_24] : memref<1x128xf32, #tpu.memory_space<vmem>>, vector<1x128xf32>
    %31 = vector.broadcast %30 : vector<1x128xf32> to vector<8x128xf32>
    %32 = arith.addf %29, %31 : vector<8x128xf32>
    %c0_25 = arith.constant 0 : index
    %c0_26 = arith.constant 0 : index
    %33 = vector.load %arg12[%c0_25, %c0_26] : memref<8x128xf32, #tpu.memory_space<vmem>>, vector<8x128xf32>
    tpu.vector_store %arg12[%c0_25, %c0_26], %32 {strides = array<i32>} : memref<8x128xf32, #tpu.memory_space<vmem>>, vector<8x128xf32>,
    return
  }
  func.func @transform_0(%arg0: i32) -> (i32, i32) {
    %c0_i32 = arith.constant 0 : i32
    %c0_i32_0 = arith.constant 0 : i32
    return %arg0, %c0_i32 : i32, i32
  }
  func.func @transform_1(%arg0: i32) -> (i32, i32) {
    %c0_i32 = arith.constant 0 : i32
    %c0_i32_0 = arith.constant 0 : i32
    %c0_i32_1 = arith.constant 0 : i32
    return %c0_i32, %c0_i32_0 : i32, i32
  }
  func.func @transform_2(%arg0: i32) -> (i32, i32) {
    %c0_i32 = arith.constant 0 : i32
    %c0_i32_0 = arith.constant 0 : i32
    %c0_i32_1 = arith.constant 0 : i32
    return %c0_i32, %c0_i32_0 : i32, i32
  }
  func.func @transform_3(%arg0: i32) -> (i32, i32) {
    %c0_i32 = arith.constant 0 : i32
    %c0_i32_0 = arith.constant 0 : i32
    %c0_i32_1 = arith.constant 0 : i32
    return %c0_i32, %c0_i32_0 : i32, i32
  }
  func.func @transform_4(%arg0: i32) -> (i32, i32) {
    %c0_i32 = arith.constant 0 : i32
    %c0_i32_0 = arith.constant 0 : i32
    %c0_i32_1 = arith.constant 0 : i32
    return %c0_i32, %c0_i32_0 : i32, i32
  }
  func.func @transform_5(%arg0: i32) -> (i32, i32) {
    %c0_i32 = arith.constant 0 : i32
    %c0_i32_0 = arith.constant 0 : i32
    %c0_i32_1 = arith.constant 0 : i32
    return %c0_i32, %c0_i32_0 : i32, i32
  }
  func.func @transform_6(%arg0: i32) -> (i32, i32) {
    %c0_i32 = arith.constant 0 : i32
    %c0_i32_0 = arith.constant 0 : i32
    %c0_i32_1 = arith.constant 0 : i32
    return %c0_i32, %c0_i32_0 : i32, i32
  }
  func.func @transform_7(%arg0: i32) -> (i32, i32) {
    %c0_i32 = arith.constant 0 : i32
    %c0_i32_0 = arith.constant 0 : i32
    %c0_i32_1 = arith.constant 0 : i32
    return %c0_i32, %c0_i32_0 : i32, i32
  }
  func.func @transform_8(%arg0: i32) -> (i32, i32) {
    %c0_i32 = arith.constant 0 : i32
    %c0_i32_0 = arith.constant 0 : i32
    %c0_i32_1 = arith.constant 0 : i32
    return %c0_i32, %c0_i32_0 : i32, i32
  }
  func.func @transform_9(%arg0: i32) -> (i32, i32) {
    %c0_i32 = arith.constant 0 : i32
    %c0_i32_0 = arith.constant 0 : i32
    %c0_i32_1 = arith.constant 0 : i32
    return %c0_i32, %c0_i32_0 : i32, i32
  }
  func.func @transform_10(%arg0: i32) -> (i32, i32) {
    %c0_i32 = arith.constant 0 : i32
    %c0_i32_0 = arith.constant 0 : i32
    %c0_i32_1 = arith.constant 0 : i32
    return %c0_i32, %c0_i32_0 : i32, i32
  }
  func.func @transform_11(%arg0: i32) -> (i32, i32) {
    %c0_i32 = arith.constant 0 : i32
    %c0_i32_0 = arith.constant 0 : i32
    return %arg0, %c0_i32 : i32, i32
  }
}

</mosaic_0001>

<bundles_post_ra>
// kernel: tpu_custom_call.1
= control target key start
LH: loop header
LB: loop body
LE: loop exit
PB: predicated region body
PF: predicated region fallthrough
CT: control target
= control target key end

     0   :  { %s2125_s0 = inlined_call_operand.hbm [shape: f32[16,128], index: 0, kind: input, shape index: {}]   ;;  %s2126_s1 = inlined_call_operand.hbm [shape: f32[128,128], index: 1, kind: input, shape index: {}]   ;;  %s2127_s2 = inlined_call_operand.vmem [shape: f32[1,128], index: 2, kind: input, shape index: {}]   ;;  %s2128_s3 = inlined_call_operand.hbm [shape: f32[128,128], index: 3, kind: input, shape index: {}]   ;;  %s2129_s4 = inlined_call_operand.vmem [shape: f32[1,128], index: 4, kind: input, shape index: {}]   ;;  %s2130_s5 = inlined_call_operand.hbm [shape: f32[128,128], index: 5, kind: input, shape index: {}]   ;;  %s2131_s6 = inlined_call_operand.vmem [shape: f32[1,128], index: 6, kind: input, shape index: {}]   ;;  %s2132_s7 = inlined_call_operand.hbm [shape: f32[128,128], index: 7, kind: input, shape index: {}]   ;;  %s2133_s8 = inlined_call_operand.vmem [shape: f32[1,128], index: 8, kind: input, shape index: {}]   ;;  %s2134_s9 = inlined_call_operand.hbm [shape: f32[128,128], index: 9, kind: input, shape index: {}]   ;;  %s2135_s10 = inlined_call_operand.vmem [shape: f32[1,128], index: 10, kind: input, shape index: {}]   ;;  %s2136_s11 = inlined_call_operand.hbm [shape: f32[16,128], index: 11, kind: output, shape index: {}]  }
   0x1   :  { %2141 = sst [smem:[#allocation20_spill]] %s2126_s1 }
   0x2   :  { %2142 = sst [smem:[#allocation21_spill]] %s2128_s3 }
   0x3   :  { %2143 = sst [smem:[#allocation22_spill]] %s2130_s5 }
   0x4   :  { %2144 = sst [smem:[#allocation23_spill]] %s2132_s7 }
   0x5   :  { %2145 = sst [smem:[#allocation24_spill]] %s2134_s9 }
   0x6   :  { %16 = vsyncpa [#allocation3], 0 }
   0x7   :  { %18 = vsyncpa [#allocation3 + $0x1], 0 }
   0x8   :  { %19 = vsyncpa [#allocation6], 0 }
   0x9   :  { %20 = vsyncpa [#allocation9], 0 }
   0xa   :  { %21 = vsyncpa [#allocation12], 0 }
   0xb   :  { %22 = vsyncpa [#allocation4], 0 }
   0xc   :  { %24 = vsyncpa [#allocation4 + $0x1], 0  ;;  %s1784_s17 = smov 0   ;;  %s1786_s18 = smov 0  }
   0xd   :  { %s1788_s19 = smov 0   ;;  %s1790_s20 = smov 0  }
   0xe LB: > { %s1713_s21 = smov [#allocation5]   ;;  %s1805_s23 = sadd.s32 4294967295, %s1711_s20   ;;  %s1711_s20 = sphi %s1790_s20, %s2174_s20   ;;  %s1707_s19 = sphi %s1788_s19, %s2173_s19   ;;  %s1703_s18 = sphi %s1786_s18, %s2172_s18   ;;  %s1699_s17 = sphi %s1784_s17, %s2171_s17  }
   0xf   : > { %s309_s22 = sshll.u32 %s1713_s21, 4  ;;  %p1082_p0 = scmp.ge.s32.totalorder %s1711_s20, 1  ;;  %s310_s22 = int_to_ptr.vmem [resolvable:$true] %s309_s22 }
  0x10   : > { %p2137_p1 = scmp.eq.s32.totalorder %s1805_s23, 0  ;;  %p297_p2 = scmp.lt.s32.totalorder %s1711_s20, 3 }
  0x11   : > { %s1714_s25 = smov [#allocation8]   ;;  %s1715_s28 = smov [#allocation7]  }
  0x12   : > { %p1810_p3 = pnand %p1082_p0, %p297_p2  ;;  %s341_s26 = sshll.u32 %s1714_s25, 4  ;;  %s1823_s26 = int_to_ptr.vmem [resolvable:$true] %s341_s26 }
  0x13   : > { %s325_s29 = sshll.u32 %s1715_s28, 4  ;;  %s1488_s12 = scalar_lea.vmem %s310_s22, 2048  ;;  %s1825_s29 = int_to_ptr.vmem [resolvable:$true] %s325_s29 }
  0x14   : > { %s2146_s24 = scalar_select %p1810_p3, 1, 0 }
  0x15   : > { %p1392_p5 = pneg %p1810_p3  ;;  %p1489_p8 = scmp.ne.s32.totalorder %s310_s22, %s1488_s12 }
  0x16   : > { %p1496_p11 = scmp.lt.s32.totalorder %s310_s22, %s310_s22  ;;  %p1497_p12 = scmp.lt.s32.totalorder %s1488_s12, %s1488_s12 }
  0x17   : > { %p1819_p6 = pnand %p1392_p5, %p2137_p1 }
  0x18   : > { %p1498_p13 = por %p1497_p12, %p1496_p11 }
  0x19   : > { %p1829_p7 = pneg %p1819_p6 }
  0x1b   : > { %p1491_p9 = pnand %p1489_p8, %p1829_p7 }
  0x1d   : > { %p1492_p10 = pneg %p1491_p9 }
  0x1f   : > { %p1499_p0 = pnand %p1498_p13, %p1492_p10 }
  0x21   : > { %1502 = shalt.err (!%p1499_p0)
}
  0x22   : > { %s1716_s13 = smov 128   ;;  %s1717_s14 = smov 8  }
  0x23   : > { %s2149_s1 = sld [smem:[#allocation20_spill]]  ;;  %s1514_s21 = scalar_lea.vmem %s1823_s26, 2048 }
  0x24   : > { %p1515_p2 = scmp.ne.s32.totalorder %s1823_s26, %s1514_s21  ;;  %p1522_p9 = scmp.lt.s32.totalorder %s1823_s26, %s1823_s26 }
  0x25   : > { %p1523_p10 = scmp.lt.s32.totalorder %s1514_s21, %s1514_s21 }
  0x26   : > { %p1517_p5 = pnand %p1515_p2, %p1829_p7 }
  0x27   : > { %p1524_p11 = por %p1523_p10, %p1522_p9 }
  0x28   : > { %p1518_p8 = pneg %p1517_p5 }
  0x29   : > { %1395 = dma.hbm_to_vmem [thread:$0]  (!%p1819_p6), %s2149_s1, 2048, %s310_s22, [#allocation6], %s1716_s13, %s1716_s13, %s1717_s14  }
  0x2a   : > { %p1525_p12 = pnand %p1524_p11, %p1518_p8 }
  0x2c   : > { %1528 = shalt.err (!%p1525_p12)
}
  0x2d   : > { %s2150_s5 = sld [smem:[#allocation22_spill]]  ;;  %s1540_s22 = scalar_lea.vmem %s1825_s29, 2048 }
  0x2e   : > { %p1541_p13 = scmp.ne.s32.totalorder %s1825_s29, %s1540_s22  ;;  %p1548_p5 = scmp.lt.s32.totalorder %s1825_s29, %s1825_s29 }
  0x2f   : > { %p1549_p8 = scmp.lt.s32.totalorder %s1540_s22, %s1540_s22 }
  0x30   : > { %p1543_p0 = pnand %p1541_p13, %p1829_p7 }
  0x31   : > { %p1550_p9 = por %p1549_p8, %p1548_p5 }
  0x32   : > { %p1544_p2 = pneg %p1543_p0 }
  0x33   : > { %1401 = dma.hbm_to_vmem [thread:$0]  (!%p1819_p6), %s2150_s5, 2048, %s1823_s26, [#allocation9], %s1716_s13, %s1716_s13, %s1717_s14  }
  0x34   : > { %p1551_p10 = pnand %p1550_p9, %p1544_p2 }
  0x36   : > { %1554 = shalt.err (!%p1551_p10)
}
  0x37   : > { %s2151_s3 = sld [smem:[#allocation21_spill]]  ;;  %s1718_s26 = smov [#allocation10]  }
  0x38   : > { %s357_s16 = sshll.u32 %s1718_s26, 4  ;;  %s1719_s21 = smov [#allocation11]   ;;  %s358_s16 = int_to_ptr.vmem [resolvable:$true] %s357_s16 }
  0x39   : > { %s373_s25 = sshll.u32 %s1719_s21, 4  ;;  %s1566_s28 = scalar_lea.vmem %s358_s16, 2048  ;;  %s374_s25 = int_to_ptr.vmem [resolvable:$true] %s373_s25 }
  0x3a   : > { %p1567_p11 = scmp.ne.s32.totalorder %s358_s16, %s1566_s28  ;;  %p1574_p0 = scmp.lt.s32.totalorder %s358_s16, %s358_s16 }
  0x3b   : > { %p1575_p2 = scmp.lt.s32.totalorder %s1566_s28, %s1566_s28 }
  0x3c   : > { %p1569_p12 = pnand %p1567_p11, %p1829_p7 }
  0x3d   : > { %1398 = dma.hbm_to_vmem [thread:$0]  (!%p1819_p6), %s2151_s3, 2048, %s1825_s29, [#allocation6], %s1716_s13, %s1716_s13, %s1717_s14  }
  0x3e   : > { %p1570_p13 = pneg %p1569_p12  ;;  %p1576_p5 = por %p1575_p2, %p1574_p0 }
  0x40   : > { %p1577_p8 = pnand %p1576_p5, %p1570_p13 }
  0x42   : > { %1580 = shalt.err (!%p1577_p8)
}
  0x43   : > { %s2152_s7 = sld [smem:[#allocation23_spill]]  ;;  %s1592_s12 = scalar_lea.vmem %s374_s25, 2048 }
  0x44   : > { %p1593_p9 = scmp.ne.s32.totalorder %s374_s25, %s1592_s12  ;;  %p1600_p12 = scmp.lt.s32.totalorder %s374_s25, %s374_s25 }
  0x45   : > { %p1601_p0 = scmp.lt.s32.totalorder %s1592_s12, %s1592_s12 }
  0x46   : > { %p1595_p10 = pnand %p1593_p9, %p1829_p7 }
  0x47   : > { %p1602_p13 = por %p1601_p0, %p1600_p12 }
  0x48   : > { %p1596_p11 = pneg %p1595_p10 }
  0x49   : > { %1404 = dma.hbm_to_vmem [thread:$0]  (!%p1819_p6), %s2152_s7, 2048, %s358_s16, [#allocation9], %s1716_s13, %s1716_s13, %s1717_s14  }
  0x4a   : > { %p1603_p2 = pnand %p1602_p13, %p1596_p11 }
  0x4c   : > { %1606 = shalt.err (!%p1603_p2)
}
  0x4d   : > { %s2153_s9 = sld [smem:[#allocation24_spill]]  ;;  %s1081_s27 = sadd.s32 4294967294, %s1711_s20  }
  0x4e   : > { %s1895_s30 = sadd.s32 1, %s1711_s20   ;;  %s37_s16 = sadd.s32 1, %s1707_s19 }
  0x4f   : > { %s34_s21 = ssub.s32 %s1711_s20, %s1895_s30  ;;  %p44_p7 = scmp.ne.s32.totalorder %s1707_s19, %s1703_s18 }
  0x50   : > { %p35_p5 = scmp.eq.s32.totalorder %s34_s21, 0  ;;  %p45_p8 = scmp.eq.s32.totalorder %s1711_s20, 0 }
  0x51   : > { %p50_p9 = scmp.ne.s32.totalorder %s1703_s18, %s1699_s17  ;;  %p284_p10 = scmp.eq.s32.totalorder %s1805_s23, 1 }
  0x52   : > { %s1907_s28 = scalar_select %p35_p5, %s1707_s19, %s37_s16  }
  0x53   : > { %1407 = dma.hbm_to_vmem [thread:$0]  (!%p1819_p6), %s2153_s9, 2048, %s374_s25, [#allocation12], %s1716_s13, %s1716_s13, %s1717_s14  }
  0x54   : > { %2154 = sst [smem:[#allocation19_spill]] %s1907_s28  ;;  %p46_p11 = por %p45_p8, %p44_p7 }
  0x55   : > { %p1911_p12 = por %p2137_p1, %p50_p9  ;;  %p1915_p6 = por %p284_p10, %p44_p7 }
  0x56   : > { %p290_p0 = scmp.eq.s32.totalorder %s1081_s27, 1  ;;  %p1421_p13 = scmp.lt.s32.totalorder %s1711_s20, 2 }
  0x57   : > { %s2155_s29 = scalar_select %p1911_p12, 1, 0 }
  0x58   : > { %s2156_s13 = scalar_select %p1915_p6, 1, 0 }
  0x59   : > { %s390_s14 = sand.u32 1, %s1707_s19   ;;  %p1921_p2 = por %p290_p0, %p50_p9 }
  0x5a   : > { %s1089_s22 = sshll.u32 %s390_s14, 3  ;;  %s1090_s12 = sshll.u32 %s1711_s20, 7 }
  0x5b   : > { %s2157_s25 = scalar_select %p1921_p2, 1, 0 }
  0x5c   : > { %s1929_s16 = scalar_lea.hbm %s2125_s0, %s1090_s12  ;;  %s394_s21 = scalar_lea.vmem [#allocation2], %s1089_s22 }
  0x5d   : > { %s401_s1 = sshll.u32 %s394_s21, 4  ;;  %p1931_p7 = pnand %p1421_p13, %p46_p11  ;;  %s402_s1 = int_to_ptr.vmem [resolvable:$true] %s401_s1 }
  0x5e   : > { %s391_s3 = scalar_lea.sflag [#allocation3], %s390_s14  ;;  %s1607_s5 = scalar_lea.hbm %s1929_s16, 128 }
  0x5f   : > { %p1608_p5 = scmp.ne.s32.totalorder %s1929_s16, %s1607_s5  ;;  %p1609_p8 = pneg %p1931_p7 }
  0x60   : > { %s1612_s26 = scalar_lea.hbm %s2125_s0, 256  ;;  %p1613_p11 = scmp.lt.s32.totalorder %s1929_s16, %s2125_s0 }
  0x61   : > { %p1610_p9 = pnand %p1609_p8, %p1608_p5  ;;  %p1614_p0 = scmp.lt.s32.totalorder %s1612_s26, %s1607_s5 }
  0x63   : > { %p1611_p10 = pneg %p1610_p9  ;;  %p1615_p13 = por %p1614_p0, %p1613_p11 }
  0x65   : > { %p1616_p4 = pnand %p1615_p13, %p1611_p10 }
  0x67   : > { %1619 = shalt.err (!%p1616_p4)
}
  0x68   : > { %s1620_s21 = scalar_lea.vmem %s402_s1, 128  ;;  %s1720_s14 = smov [#allocation2]  }
  0x69   : > { %p1621_p1 = scmp.ne.s32.totalorder %s402_s1, %s1620_s21  ;;  %s1625_s9 = sshll.u32 %s1720_s14, 4  ;;  %s1626_s9 = int_to_ptr.vmem [resolvable:$false] %s1625_s9 }
  0x6a   : > { %s1627_s28 = scalar_lea.vmem %s1626_s9, 256  ;;  %p1628_p5 = scmp.lt.s32.totalorder %s402_s1, %s1626_s9 }
  0x6b   : > { %p1623_p2 = pnand %p1621_p1, %p1609_p8  ;;  %p1629_p9 = scmp.lt.s32.totalorder %s1627_s28, %s1620_s21 }
  0x6d   : > { %p1624_p6 = pneg %p1623_p2  ;;  %p1630_p12 = por %p1629_p9, %p1628_p5 }
  0x6f   : > { %p1631_p3 = pnand %p1630_p12, %p1624_p6 }
  0x71   : > { %1634 = shalt.err (!%p1631_p3)
}
  0x72   : > { %1411 = dma.hbm_to_vmem [thread:$0]  (!%p1931_p7), %s1929_s16, 128, %s402_s1, %s391_s3  }
  0x73   : > { %p2159_p10 = scmp.ne.s32.totalorder %s2146_s24, 0 }
  0x74   : > { %s1952_s5 = sand.u32 (!%p2159_p10), 1, %s1703_s18   ;;  %p2160_p1 = scmp.ne.s32.totalorder (!%p2159_p10), %s2155_s29, 0 }
  0x75   : > { %410 = sbr.rel (%p2159_p10) target bundleno = 1216 (0x4c0), region = 64  ;;  %s1092_s7 = sshll.u32 (!%p2159_p10), %s1952_s5, 3 }
  0x76   : > { %s413_s9 = scalar_lea.sflag (!%p2159_p10), [#allocation3], %s1952_s5  ;;  %s1958_s28 = scalar_lea.vmem (!%p2159_p10), [#allocation2], %s1092_s7 }
  0x7a   : > { %1678 = dma.done.wait (%p2160_p1), %s413_s9, 128  }
  0x7b   : > { %1680 = vsyncadd (%p2160_p1), %s413_s9, 4294967168  ;;  %p2161_p3 = scmp.eq.s32.totalorder %s1805_s23, 0 }
  0x7d   : > { %1682 = dma.done.wait (%p2161_p3), [#allocation6], 4096   ;;  %p2162_p4 = pmov %p2161_p3 }
  0x7e   : > { %p2163_p12 = pmov %p2161_p3 }
  0x7f   : > { %1684 = vsyncadd (%p2162_p4), [#allocation6], 4294963200 }
  0x80   : > { %1686 = dma.done.wait (%p2163_p12), [#allocation9], 4096   ;;  %p2164_p6 = pmov %p2161_p3 }
  0x81   : > { %p2165_p2 = pmov %p2161_p3 }
  0x82   : > { %1688 = vsyncadd (%p2164_p6), [#allocation9], 4294963200 }
  0x83   : > { %1690 = dma.done.wait (%p2165_p2), [#allocation12], 2048   ;;  %p2166_p7 = pmov %p2165_p2 }
  0x84   : > { %v1721_v0 = vmov 0.0   ;;  %vm1722_vm0 = vmmov 0   ;;  %v491_v1 = vld [vmem:[#allocation5 + $0x78] sm:$0xff]  ;;  %v490_v2 = vld [vmem:[#allocation5 + $0x70] sm:$0xff]  ;;  %v489_v3 = vld [vmem:[#allocation5 + $0x68] sm:$0xff]  ;;  %s1105_s21 = sshll.u32 %s1805_s23, 7 }
  0x85   : > { %1692 = vsyncadd (%p2166_p7), [#allocation12], 4294965248  ;;  %1193 = vmatprep.subr.mxu0 %v1721_v0  ;;  %1225 = vmatprep.mubr.msk.f32.mxu0 %vm1722_vm0, %v1721_v0  ;;  %v488_v4 = vld [vmem:[#allocation5 + $0x60] sm:$0xff]  ;;  %v585_v5 = vld [vmem:[#allocation7 + $0x78] sm:$0xff]  ;;  %s474_s14 = scalar_lea.vmem [#allocation13], %s1092_s7  ;;  %s2088_s3 = scalar_lea.hbm %s2136_s11, %s1105_s21 }
  0x86   : > { %1228 = vmatprep.subr.mxu1 %v1721_v0  ;;  %1260 = vmatprep.mubr.msk.f32.mxu1 %vm1722_vm0, %v1721_v0  ;;  %v487_v6 = vld [vmem:[#allocation5 + $0x58] sm:$0xff]  ;;  %v584_v7 = vld [vmem:[#allocation7 + $0x70] sm:$0xff]  ;;  %v583_v8 = vld [vmem:[#allocation7 + $0x68] sm:$0xff]  ;;  %s963_s9 = sshll.u32 %s474_s14, 4  ;;  %s950_s24 = scalar_lea.sflag [#allocation4], %s1952_s5  ;;  %s964_s9 = int_to_ptr.vmem [resolvable:$true] %s963_s9 }
  0x87   : > { %1194 = vmatpush3.msra.mxu0 %v491_v1  ;;  %1229 = vmatpush3.msra.mxu1 %v585_v5  ;;  %v486_v9 = vld [vmem:[#allocation5 + $0x50] sm:$0xff]  ;;  %v582_v10 = vld [vmem:[#allocation7 + $0x60] sm:$0xff]  ;;  %v485_v11 = vld [vmem:[#allocation5 + $0x48] sm:$0xff]  ;;  %s1635_s29 = scalar_lea.vmem %s964_s9, 128  ;;  %p2167_p11 = scmp.ne.s32.totalorder %s2156_s13, 0 }
  0x88   : > { %1195 = vmatprep.subr.mxu0 %v1721_v0  ;;  %1230 = vmatprep.subr.mxu1 %v1721_v0  ;;  %v581_v12 = vld [vmem:[#allocation7 + $0x58] sm:$0xff]  ;;  %v484_v13 = vld [vmem:[#allocation5 + $0x40] sm:$0xff]  ;;  %v580_v14 = vld [vmem:[#allocation7 + $0x50] sm:$0xff]  ;;  %p1636_p8 = scmp.ne.s32.totalorder %s964_s9, %s1635_s29  ;;  %s1723_s23 = smov [#allocation13]  }
  0x89   : > { %1196 = vmatpush3.msra.mxu0 %v490_v2  ;;  %1231 = vmatpush3.msra.mxu1 %v584_v7  ;;  %v483_v15 = vld [vmem:[#allocation5 + $0x38] sm:$0xff]  ;;  %v579_v16 = vld [vmem:[#allocation7 + $0x48] sm:$0xff]  ;;  %v482_v17 = vld [vmem:[#allocation5 + $0x30] sm:$0xff]  ;;  %s1639_s16 = sshll.u32 %s1723_s23, 4  ;;  %s1640_s16 = int_to_ptr.vmem [resolvable:$false] %s1639_s16 }
  0x8a   : > { %1197 = vmatprep.subr.mxu0 %v1721_v0  ;;  %1232 = vmatprep.subr.mxu1 %v1721_v0  ;;  %v481_v18 = vld [vmem:[#allocation5 + $0x28] sm:$0xff]  ;;  %v480_v19 = vld [vmem:[#allocation5 + $0x20] sm:$0xff]  ;;  %v479_v20 = vld [vmem:[#allocation5 + $0x18] sm:$0xff]  ;;  %p1637_p0 = pnand %p1636_p8, %p2167_p11  ;;  %s1641_s7 = scalar_lea.vmem %s1640_s16, 256 }
  0x8b   : > { %1198 = vmatpush3.msra.mxu0 %v489_v3  ;;  %1233 = vmatpush3.msra.mxu1 %v583_v8  ;;  %v478_v21 = vld [vmem:[#allocation5 + $0x10] sm:$0xff]  ;;  %v477_v22 = vld [vmem:[#allocation5 + $0x8] sm:$0xff]  ;;  %v476_v23 = vld [vmem:[#allocation5] sm:$0xff]  ;;  %p1642_p5 = scmp.lt.s32.totalorder %s964_s9, %s1640_s16  ;;  %p1643_p9 = scmp.lt.s32.totalorder %s1641_s7, %s1635_s29 }
  0x8c   : > { %1199 = vmatprep.subr.mxu0 %v1721_v0  ;;  %1234 = vmatprep.subr.mxu1 %v1721_v0  ;;  %v475_v24 = vld [vmem:[%s1958_s28] sm:$0xff]  ;;  %v578_v25 = vld [vmem:[#allocation7 + $0x40] sm:$0xff]  ;;  %v575_v28 = vld [vmem:[#allocation7 + $0x28] sm:$0xff]  ;;  %p1638_p13 = pneg %p1637_p0 }
  0x8d   : > { %1200 = vmatpush3.msra.mxu0 %v488_v4  ;;  %1235 = vmatpush3.msra.mxu1 %v582_v10  ;;  %v577_v26 = vld [vmem:[#allocation7 + $0x38] sm:$0xff]  ;;  %v576_v27 = vld [vmem:[#allocation7 + $0x30] sm:$0xff]  ;;  %v574_v29 = vld [vmem:[#allocation7 + $0x20] sm:$0xff]  ;;  %p1644_p10 = por %p1643_p9, %p1642_p5 }
  0x8e   : > { %1201 = vmatprep.subr.mxu0 %v1721_v0  ;;  %1236 = vmatprep.subr.mxu1 %v1721_v0  ;;  %v573_v30 = vld [vmem:[#allocation7 + $0x18] sm:$0xff]  ;;  %v572_v31 = vld [vmem:[#allocation7 + $0x10] sm:$0xff]  ;;  %v571_v32 = vld [vmem:[#allocation7 + $0x8] sm:$0xff] }
  0x8f   : > { %1202 = vmatpush3.msra.mxu0 %v487_v6  ;;  %1237 = vmatpush3.msra.mxu1 %v581_v12  ;;  %v570_v33 = vld [vmem:[#allocation7] sm:$0xff]  ;;  %v680_v34 = vld [vmem:[#allocation8 + $0x78] sm:$0xff]  ;;  %v679_v35 = vld [vmem:[#allocation8 + $0x70] sm:$0xff]  ;;  %p1645_p1 = pnand %p1644_p10, %p1638_p13 }
  0x90   : > { %1203 = vmatprep.subr.mxu0 %v1721_v0  ;;  %1238 = vmatprep.subr.mxu1 %v1721_v0  ;;  %v678_v36 = vld [vmem:[#allocation8 + $0x68] sm:$0xff]  ;;  %v677_v37 = vld [vmem:[#allocation8 + $0x60] sm:$0xff]  ;;  %v676_v38 = vld [vmem:[#allocation8 + $0x58] sm:$0xff] }
  0x91   : > { %1204 = vmatpush3.msra.mxu0 %v486_v9  ;;  %1239 = vmatpush3.msra.mxu1 %v580_v14  ;;  %v675_v39 = vld [vmem:[#allocation8 + $0x50] sm:$0xff]  ;;  %v674_v45 = vld [vmem:[#allocation8 + $0x48] sm:$0xff]  ;;  %v673_v46 = vld [vmem:[#allocation8 + $0x40] sm:$0xff] }
  0x92   : > { %1205 = vmatprep.subr.mxu0 %v1721_v0  ;;  %1240 = vmatprep.subr.mxu1 %v1721_v0  ;;  %v1099_v40 = vld [vmem:[%s2127_s2] ss:$0 sm:$0xff]  ;;  %v672_v47 = vld [vmem:[#allocation8 + $0x38] sm:$0xff]  ;;  %v670_v49 = vld [vmem:[#allocation8 + $0x28] sm:$0xff] }
  0x93   : > { %1206 = vmatpush3.msra.mxu0 %v485_v11  ;;  %1241 = vmatpush3.msra.mxu1 %v579_v16  ;;  %v671_v48 = vld [vmem:[#allocation8 + $0x30] sm:$0xff]  ;;  %v669_v50 = vld [vmem:[#allocation8 + $0x20] sm:$0xff]  ;;  %v668_v51 = vld [vmem:[#allocation8 + $0x18] sm:$0xff] }
  0x94   : > { %1207 = vmatprep.subr.mxu0 %v1721_v0  ;;  %1242 = vmatprep.subr.mxu1 %v1721_v0  ;;  %v667_v52 = vld [vmem:[#allocation8 + $0x10] sm:$0xff]  ;;  %v666_v53 = vld [vmem:[#allocation8 + $0x8] sm:$0xff]  ;;  %v665_v54 = vld [vmem:[#allocation8] sm:$0xff] }
  0x95   : > { %1208 = vmatpush3.msra.mxu0 %v484_v13  ;;  %1243 = vmatpush3.msra.mxu1 %v578_v25  ;;  %v775_v55 = vld [vmem:[#allocation10 + $0x78] sm:$0xff]  ;;  %v774_v56 = vld [vmem:[#allocation10 + $0x70] sm:$0xff]  ;;  %v773_v57 = vld [vmem:[#allocation10 + $0x68] sm:$0xff] }
  0x96   : > { %1209 = vmatprep.subr.mxu0 %v1721_v0  ;;  %1244 = vmatprep.subr.mxu1 %v1721_v0  ;;  %v772_v58 = vld [vmem:[#allocation10 + $0x60] sm:$0xff]  ;;  %v771_v59 = vld [vmem:[#allocation10 + $0x58] sm:$0xff]  ;;  %v770_v60 = vld [vmem:[#allocation10 + $0x50] sm:$0xff] }
  0x97   : > { %1210 = vmatpush3.msra.mxu0 %v483_v15  ;;  %1245 = vmatpush3.msra.mxu1 %v577_v26  ;;  %v1100_v61 = vld [vmem:[%s2129_s4] ss:$0 sm:$0xff]  ;;  %v769_v4 = vld [vmem:[#allocation10 + $0x48] sm:$0xff]  ;;  %v768_v5 = vld [vmem:[#allocation10 + $0x40] sm:$0xff] }
  0x98   : > { %1211 = vmatprep.subr.mxu0 %v1721_v0  ;;  %1246 = vmatprep.subr.mxu1 %v1721_v0  ;;  %v767_v6 = vld [vmem:[#allocation10 + $0x38] sm:$0xff]  ;;  %v766_v7 = vld [vmem:[#allocation10 + $0x30] sm:$0xff]  ;;  %v765_v8 = vld [vmem:[#allocation10 + $0x28] sm:$0xff] }
  0x99   : > { %1212 = vmatpush3.msra.mxu0 %v482_v17  ;;  %1247 = vmatpush3.msra.mxu1 %v576_v27  ;;  %v764_v9 = vld [vmem:[#allocation10 + $0x20] sm:$0xff]  ;;  %v763_v10 = vld [vmem:[#allocation10 + $0x18] sm:$0xff]  ;;  %v762_v11 = vld [vmem:[#allocation10 + $0x10] sm:$0xff] }
  0x9a   : > { %1213 = vmatprep.subr.mxu0 %v1721_v0  ;;  %1248 = vmatprep.subr.mxu1 %v1721_v0  ;;  %v761_v12 = vld [vmem:[#allocation10 + $0x8] sm:$0xff]  ;;  %v760_v13 = vld [vmem:[#allocation10] sm:$0xff]  ;;  %v870_v14 = vld [vmem:[#allocation11 + $0x78] sm:$0xff] }
  0x9b   : > { %1214 = vmatpush3.msra.mxu0 %v481_v18  ;;  %1249 = vmatpush3.msra.mxu1 %v575_v28  ;;  %v869_v15 = vld [vmem:[#allocation11 + $0x70] sm:$0xff]  ;;  %v868_v16 = vld [vmem:[#allocation11 + $0x68] sm:$0xff]  ;;  %v867_v17 = vld [vmem:[#allocation11 + $0x60] sm:$0xff] }
  0x9c   : > { %1215 = vmatprep.subr.mxu0 %v1721_v0  ;;  %1250 = vmatprep.subr.mxu1 %v1721_v0  ;;  %v866_v18 = vld [vmem:[#allocation11 + $0x58] sm:$0xff]  ;;  %v864_v26 = vld [vmem:[#allocation11 + $0x48] sm:$0xff]  ;;  %v863_v27 = vld [vmem:[#allocation11 + $0x40] sm:$0xff] }
  0x9d   : > { %1216 = vmatpush3.msra.mxu0 %v480_v19  ;;  %1251 = vmatpush3.msra.mxu1 %v574_v29  ;;  %v865_v19 = vld [vmem:[#allocation11 + $0x50] sm:$0xff]  ;;  %v862_v28 = vld [vmem:[#allocation11 + $0x38] sm:$0xff] }
  0x9e   : > { %1217 = vmatprep.subr.mxu0 %v1721_v0  ;;  %1252 = vmatprep.subr.mxu1 %v1721_v0  ;;  %v861_v29 = vld [vmem:[#allocation11 + $0x30] sm:$0xff] }
  0x9f   : > { %1218 = vmatpush3.msra.mxu0 %v479_v20  ;;  %1253 = vmatpush3.msra.mxu1 %v573_v30  ;;  %v1101_v20 = vld [vmem:[%s2131_s6] ss:$0 sm:$0xff]  ;;  %v860_v30 = vld [vmem:[#allocation11 + $0x28] sm:$0xff] }
  0xa0   : > { %1219 = vmatprep.subr.mxu0 %v1721_v0  ;;  %1254 = vmatprep.subr.mxu1 %v1721_v0 }
  0xa1   : > { %1220 = vmatpush3.msra.mxu0 %v478_v21  ;;  %1255 = vmatpush3.msra.mxu1 %v572_v31  ;;  %v859_v31 = vld [vmem:[#allocation11 + $0x20] sm:$0xff] }
  0xa2   : > { %1221 = vmatprep.subr.mxu0 %v1721_v0  ;;  %1256 = vmatprep.subr.mxu1 %v1721_v0 }
  0xa3   : > { %1222 = vmatpush3.msra.mxu0 %v477_v22  ;;  %1257 = vmatpush3.msra.mxu1 %v571_v32  ;;  %v858_v32 = vld [vmem:[#allocation11 + $0x18] sm:$0xff] }
  0xa4   : > { %1223 = vmatprep.subr.mxu0 %v1721_v0  ;;  %1258 = vmatprep.subr.mxu1 %v1721_v0 }
  0xa5   : > { %1224 = vmatpush3.msra.mxu0 %v476_v23  ;;  %1259 = vmatpush3.msra.mxu1 %v570_v33  ;;  %v857_v33 = vld [vmem:[#allocation11 + $0x10] sm:$0xff] }
  0xa6   : > { %1226 = vmatmul.mubr.f32.vlgmr.msra.gmra.mxu0 %v475_v24  ;;  %1263 = vmatprep.subr.mxu0 %v1721_v0 }
  0xa7   : > { %1295 = vmatprep.mubr.msk.f32.mxu0 %vm1722_vm0, %v1721_v0  ;;  %1298 = vmatprep.subr.mxu1 %v1721_v0 }
  0xa8   : > { %1264 = vmatpush3.msra.mxu0 %v680_v34  ;;  %v856_v34 = vld [vmem:[#allocation11 + $0x8] sm:$0xff] }
  0xa9   : > { %1265 = vmatprep.subr.mxu0 %v1721_v0 }
  0xaa   : > { %1266 = vmatpush3.msra.mxu0 %v679_v35  ;;  %v855_v35 = vld [vmem:[#allocation11] sm:$0xff] }
  0xab   : > { %1267 = vmatprep.subr.mxu0 %v1721_v0 }
  0xac   : > { %1268 = vmatpush3.msra.mxu0 %v678_v36  ;;  %v1102_v36 = vld [vmem:[%s2133_s8] ss:$0 sm:$0xff] }
  0xad   : > { %1269 = vmatprep.subr.mxu0 %v1721_v0 }
  0xae   : > { %1270 = vmatpush3.msra.mxu0 %v677_v37 }
  0xaf   : > { %1271 = vmatprep.subr.mxu0 %v1721_v0 }
  0xb0   : > { %1272 = vmatpush3.msra.mxu0 %v676_v38 }
  0xb1   : > { %1273 = vmatprep.subr.mxu0 %v1721_v0 }
  0xb2   : > { %1274 = vmatpush3.msra.mxu0 %v675_v39 }
  0xb3   : > { %1275 = vmatprep.subr.mxu0 %v1721_v0 }
  0xb4   : > { %1276 = vmatpush3.msra.mxu0 %v674_v45 }
  0xb5   : > { %1277 = vmatprep.subr.mxu0 %v1721_v0 }
  0xb6   : > { %1278 = vmatpush3.msra.mxu0 %v673_v46 }
  0xb7   : > { %1279 = vmatprep.subr.mxu0 %v1721_v0 }
  0xb8   : > { %1280 = vmatpush3.msra.mxu0 %v672_v47 }
  0xb9   : > { %1281 = vmatprep.subr.mxu0 %v1721_v0 }
  0xba   : > { %1282 = vmatpush3.msra.mxu0 %v671_v48 }
  0xbb   : > { %1283 = vmatprep.subr.mxu0 %v1721_v0 }
  0xbc   : > { %1284 = vmatpush3.msra.mxu0 %v670_v49 }
  0xbd   : > { %1285 = vmatprep.subr.mxu0 %v1721_v0 }
  0xbe   : > { %1286 = vmatpush3.msra.mxu0 %v669_v50 }
  0xbf   : > { %1287 = vmatprep.subr.mxu0 %v1721_v0 }
  0xc0   : > { %1288 = vmatpush3.msra.mxu0 %v668_v51 }
  0xc1   : > { %1289 = vmatprep.subr.mxu0 %v1721_v0 }
  0xc2   : > { %1290 = vmatpush3.msra.mxu0 %v667_v52 }
  0xc3   : > { %1291 = vmatprep.subr.mxu0 %v1721_v0 }
  0xc4   : > { %1292 = vmatpush3.msra.mxu0 %v666_v53 }
  0xc5   : > { %1293 = vmatprep.subr.mxu0 %v1721_v0 }
  0xc6   : > { %1294 = vmatpush3.msra.mxu0 %v665_v54 }
  0xc7   : > { %1333 = vmatprep.subr.mxu0 %v1721_v0 }
 0x166   : > { %v565_v41 = vpop.f32.mrf.mxu0 }
 0x167   : > { %v566_v42 = vadd.f32 %v1099_v40, %v565_v41 }
 0x168   : > { %v1227_v43 = vpop.f32.mrf.mxu0 }
 0x169   : > { %1469 = vtanh.f32 %v566_v42  ;;  %v1103_v42 = vld [vmem:[%s2135_s10] ss:$0 sm:$0xff] }
 0x176   : > { %v1470_v44 = vpop.eup %1469 }
 0x177   : > { %1261 = vmatmul.mubr.f32.vlgmr.msra.gmra.mxu1 %v1470_v44 }
 0x178   : > { %1330 = vmatprep.mubr.msk.f32.mxu1 %vm1722_vm0, %v1721_v0  ;;  %1299 = vmatpush3.msra.mxu1 %v775_v55 }
 0x179   : > { %1300 = vmatprep.subr.mxu1 %v1721_v0 }
 0x17a   : > { %1301 = vmatpush3.msra.mxu1 %v774_v56 }
 0x17b   : > { %1302 = vmatprep.subr.mxu1 %v1721_v0 }
 0x17c   : > { %1303 = vmatpush3.msra.mxu1 %v773_v57 }
 0x17d   : > { %1304 = vmatprep.subr.mxu1 %v1721_v0 }
 0x17e   : > { %1305 = vmatpush3.msra.mxu1 %v772_v58 }
 0x17f   : > { %1306 = vmatprep.subr.mxu1 %v1721_v0 }
 0x180   : > { %1307 = vmatpush3.msra.mxu1 %v771_v59 }
 0x181   : > { %1308 = vmatprep.subr.mxu1 %v1721_v0 }
 0x182   : > { %1309 = vmatpush3.msra.mxu1 %v770_v60 }
 0x183   : > { %1310 = vmatprep.subr.mxu1 %v1721_v0 }
 0x184   : > { %1311 = vmatpush3.msra.mxu1 %v769_v4 }
 0x185   : > { %1312 = vmatprep.subr.mxu1 %v1721_v0 }
 0x186   : > { %1313 = vmatpush3.msra.mxu1 %v768_v5 }
 0x187   : > { %1314 = vmatprep.subr.mxu1 %v1721_v0 }
 0x188   : > { %1315 = vmatpush3.msra.mxu1 %v767_v6 }
 0x189   : > { %1316 = vmatprep.subr.mxu1 %v1721_v0 }
 0x18a   : > { %1317 = vmatpush3.msra.mxu1 %v766_v7 }
 0x18b   : > { %1318 = vmatprep.subr.mxu1 %v1721_v0 }
 0x18c   : > { %1319 = vmatpush3.msra.mxu1 %v765_v8 }
 0x18d   : > { %1320 = vmatprep.subr.mxu1 %v1721_v0 }
 0x18e   : > { %1321 = vmatpush3.msra.mxu1 %v764_v9 }
 0x18f   : > { %1322 = vmatprep.subr.mxu1 %v1721_v0 }
 0x190   : > { %1323 = vmatpush3.msra.mxu1 %v763_v10 }
 0x191   : > { %1324 = vmatprep.subr.mxu1 %v1721_v0 }
 0x192   : > { %1325 = vmatpush3.msra.mxu1 %v762_v11 }
 0x193   : > { %1326 = vmatprep.subr.mxu1 %v1721_v0 }
 0x194   : > { %1327 = vmatpush3.msra.mxu1 %v761_v12 }
 0x195   : > { %1328 = vmatprep.subr.mxu1 %v1721_v0 }
 0x196   : > { %1329 = vmatpush3.msra.mxu1 %v760_v13 }
 0x237   : > { %v659_v62 = vpop.f32.mrf.mxu1 }
 0x238   : > { %v660_v63 = vadd.f32 %v1100_v61, %v659_v62 }
 0x239   : > { %v1262_v1 = vpop.f32.mrf.mxu1 }
 0x23a   : > { %v663_v2 = vadd.f32 %v1470_v44, %v660_v63 }
 0x23c   : > { %1471 = vtanh.f32 %v663_v2 }
 0x249   : > { %v1472_v3 = vpop.eup %1471 }
 0x24a   : > { %1296 = vmatmul.mubr.f32.vlgmr.msra.gmra.mxu0 %v1472_v3 }
 0x24b   : > { %1365 = vmatprep.mubr.msk.f32.mxu0 %vm1722_vm0, %v1721_v0  ;;  %1334 = vmatpush3.msra.mxu0 %v870_v14 }
 0x24c   : > { %1335 = vmatprep.subr.mxu0 %v1721_v0 }
 0x24d   : > { %1336 = vmatpush3.msra.mxu0 %v869_v15 }
 0x24e   : > { %1337 = vmatprep.subr.mxu0 %v1721_v0 }
 0x24f   : > { %1338 = vmatpush3.msra.mxu0 %v868_v16 }
 0x250   : > { %1339 = vmatprep.subr.mxu0 %v1721_v0 }
 0x251   : > { %1340 = vmatpush3.msra.mxu0 %v867_v17 }
 0x252   : > { %1341 = vmatprep.subr.mxu0 %v1721_v0 }
 0x253   : > { %1342 = vmatpush3.msra.mxu0 %v866_v18 }
 0x254   : > { %1343 = vmatprep.subr.mxu0 %v1721_v0 }
 0x255   : > { %1344 = vmatpush3.msra.mxu0 %v865_v19 }
 0x256   : > { %1345 = vmatprep.subr.mxu0 %v1721_v0 }
 0x257   : > { %1346 = vmatpush3.msra.mxu0 %v864_v26 }
 0x258   : > { %1347 = vmatprep.subr.mxu0 %v1721_v0 }
 0x259   : > { %1348 = vmatpush3.msra.mxu0 %v863_v27 }
 0x25a   : > { %1349 = vmatprep.subr.mxu0 %v1721_v0 }
 0x25b   : > { %1350 = vmatpush3.msra.mxu0 %v862_v28 }
 0x25c   : > { %1351 = vmatprep.subr.mxu0 %v1721_v0 }
 0x25d   : > { %1352 = vmatpush3.msra.mxu0 %v861_v29 }
 0x25e   : > { %1353 = vmatprep.subr.mxu0 %v1721_v0 }
 0x25f   : > { %1354 = vmatpush3.msra.mxu0 %v860_v30 }
 0x260   : > { %1355 = vmatprep.subr.mxu0 %v1721_v0 }
 0x261   : > { %1356 = vmatpush3.msra.mxu0 %v859_v31 }
 0x262   : > { %1357 = vmatprep.subr.mxu0 %v1721_v0 }
 0x263   : > { %1358 = vmatpush3.msra.mxu0 %v858_v32 }
 0x264   : > { %1359 = vmatprep.subr.mxu0 %v1721_v0 }
 0x265   : > { %1360 = vmatpush3.msra.mxu0 %v857_v33 }
 0x266   : > { %1361 = vmatprep.subr.mxu0 %v1721_v0 }
 0x267   : > { %1362 = vmatpush3.msra.mxu0 %v856_v34 }
 0x268   : > { %1363 = vmatprep.subr.mxu0 %v1721_v0 }
 0x269   : > { %1364 = vmatpush3.msra.mxu0 %v855_v35 }
 0x30a   : > { %v754_v21 = vpop.f32.mrf.mxu0 }
 0x30b   : > { %v755_v22 = vadd.f32 %v1101_v20, %v754_v21 }
 0x30c   : > { %v1297_v23 = vpop.f32.mrf.mxu0 }
 0x30d   : > { %v758_v24 = vadd.f32 %v1472_v3, %v755_v22 }
 0x30f   : > { %1473 = vtanh.f32 %v758_v24 }
 0x31c   : > { %v1474_v25 = vpop.eup %1473 }
 0x31d   : > { %1331 = vmatmul.mubr.f32.vlgmr.msra.gmra.mxu1 %v1474_v25 }
 0x3dd   : > { %v849_v37 = vpop.f32.mrf.mxu1 }
 0x3de   : > { %v850_v38 = vadd.f32 %v1102_v36, %v849_v37 }
 0x3df   : > { %v1332_v39 = vpop.f32.mrf.mxu1 }
 0x3e0   : > { %v853_v40 = vadd.f32 %v1474_v25, %v850_v38 }
 0x3e2   : > { %1475 = vtanh.f32 %v853_v40 }
 0x3ef   : > { %v1476_v41 = vpop.eup %1475 }
 0x3f0   : > { %1366 = vmatmul.mubr.f32.vlgmr.msra.gmra.mxu0 %v1476_v41 }
 0x4b0   : > { %v944_v0 = vpop.f32.mrf.mxu0 }
 0x4b1   : > { %v945_v43 = vadd.f32 %v1103_v42, %v944_v0 }
 0x4b2   : > { %v1367_v44 = vpop.f32.mrf.mxu0 }
 0x4b3   : > { %948 = vst [vmem:[%s474_s14] sm:$0xff] %v945_v43 }
 0x4b4   : > { %1648 = shalt.err (!%p1645_p1)
}
 0x4b5   : > { %s1649_s27 = scalar_lea.hbm %s2088_s3, 128  ;;  %s1653_s15 = scalar_lea.hbm %s2136_s11, 256 }
 0x4b6   : > { %p1650_p3 = scmp.ne.s32.totalorder %s2088_s3, %s1649_s27  ;;  %p1654_p6 = scmp.lt.s32.totalorder %s2088_s3, %s2136_s11 }
 0x4b7   : > { %p1655_p2 = scmp.lt.s32.totalorder %s1653_s15, %s1649_s27 }
 0x4b8   : > { %p1651_p4 = pnand %p1650_p3, %p2167_p11 }
 0x4b9   : > { %p1656_p7 = por %p1655_p2, %p1654_p6 }
 0x4ba   : > { %p1652_p12 = pneg %p1651_p4 }
 0x4bc   : > { %p1657_p8 = pnand %p1656_p7, %p1652_p12 }
 0x4be   : > { %1660 = shalt.err (!%p1657_p8)
}
 0x4bf   : > { %1390 = dma.vmem_to_hbm [thread:$0]  (%p2167_p11), %s964_s9, 128, %s2088_s3, %s950_s24  }
 0x4c0 PF: > { %s975_s21 = sand.u32 1, %s1699_s17   ;;  %p2168_p0 = scmp.ne.s32.totalorder %s2157_s25, 0 }
 0x4c1   : > { %p2169_p13 = scmp.ge.s32.totalorder %s1711_s20, 2  ;;  %s976_s14 = scalar_lea.sflag [#allocation4], %s975_s21 }
 0x4c3   : > { %p1413_p5 = pnand %p2169_p13, %p2168_p0 }
 0x4c5   : > { %p1414_p9 = pneg %p1413_p5 }
 0x4c7   : > { %1694 = dma.done.wait (%p1414_p9), %s976_s14, 128  }
 0x4c8   : > { %1696 = vsyncadd (%p1414_p9), %s976_s14, 4294967168  ;;  %s2170_s28 = sld [smem:[#allocation19_spill]]  ;;  %p27_p10 = scmp.ge.s32.totalorder %s1895_s30, 4  }
 0x4c9   : > { %s2171_s17 = smov %s1703_s18  ;;  %s2172_s18 = smov %s1707_s19 }
 0x4ca   : > { %s2174_s20 = smov %s1895_s30  ;;  %29 = sbr.rel (!%p27_p10) target bundleno = 14 (0xe), region = 129 }
 0x4ce   : > { %s2173_s19 = smov %s2170_s28 }
 0x4cf   :  { %981 = vsyncpa [#allocation3], 1 }
 0x4d0   :  { %983 = vsyncpa [#allocation3 + $0x1], 1 }
 0x4d1   :  { %984 = vsyncpa [#allocation6], 1 }
 0x4d2   :  { %985 = vsyncpa [#allocation9], 1 }
 0x4d3   :  { %986 = vsyncpa [#allocation12], 1 }
 0x4d4   :  { %987 = vsyncpa [#allocation4], 1 }
 0x4d5   :  { %989 = vsyncpa [#allocation4 + $0x1], 1 }

</bundles_post_ra>
